<compile_context>
chip_gen: v7x
topology: tpu7x:2x2x1
jax: 0.10.0
libtpu: 0.0.40
codegen_flags: <defaults>
</compile_context>

<pallas_src>
import functools

import jax
import jax.numpy as jnp
import numpy as np
from jax import lax
from jax.experimental import pallas as pl
from jax.experimental.pallas import tpu as pltpu

_LANES = 128
_SUBLANES = 8
_MAX_TILE_ROWS = 2048    # (2048, 128) f32 = 1 MiB per input block; 2 in x 2 buf = 4 MiB VMEM
_NUM_CORE_SPLITS = 2     # "parallel" leading grid axis (2 TCs on v7x; harmless elsewhere)


def _dice_partial_kernel(x_ref, t_ref, out_ref, acc_ref, *, rows_valid, need_mask):
    c = pl.program_id(0)
    i = pl.program_id(1)

    @pl.when(i == 0)
    def _():
        acc_ref[...] = jnp.zeros_like(acc_ref)

    x = x_ref[...].astype(jnp.float32)
    t = t_ref[...].astype(jnp.float32)
    tile_rows = x.shape[0]

    if need_mask:
        # Global row index of every element.  Rows at/after `rows_valid` are
        # either grid overhang (unspecified garbage) or a clamped duplicate
        # tile -> select them to 0 so they contribute nothing (and NaN/Inf
        # garbage cannot propagate through the sums).
        row_base = (c * pl.num_programs(1) + i) * tile_rows
        row = lax.broadcasted_iota(jnp.int32, x.shape, 0) + row_base
        valid = row < rows_valid
        x = jnp.where(valid, x, 0.0)
        t = jnp.where(valid, t, 0.0)

    # Fold the big tile into a fixed (8, 128) accumulator plane: pure VPU adds,
    # no cross-lane work inside the hot loop.
    acc_ref[0] += (x * t).reshape(-1, _SUBLANES, _LANES).sum(axis=0)  # intersection
    acc_ref[1] += (x + t).reshape(-1, _SUBLANES, _LANES).sum(axis=0)  # sum(x) + sum(t)

    @pl.when(i == pl.num_programs(1) - 1)
    def _():
        out_ref[0] = acc_ref[...]


def dice_loss(inputs, targets, smooth=1.0):
    """Pallas TPU implementation of DiceLoss.forward (returns a scalar)."""
    x = jnp.reshape(inputs, (-1,))
    t = jnp.reshape(targets, (-1,))
    # bool has awkward VMEM layouts; widen to int8 (still 1 B/elem).
    if x.dtype == jnp.bool_:
        x = x.astype(jnp.int8)
    if t.dtype == jnp.bool_:
        t = t.astype(jnp.int8)
    n = x.shape[0]

    # Pad with zeros only when the flat length is not (8*128)-aligned.  Zeros
    # are exact no-ops for every dice sum, so no extra masking is needed for
    # the padded tail.
    chunk = _SUBLANES * _LANES
    pad = (-n) % chunk
    if pad:
        x = jnp.pad(x, (0, pad))
        t = jnp.pad(t, (0, pad))
    rows = (n + pad) // _LANES                      # multiple of 8

    tile_rows = min(_MAX_TILE_ROWS, rows)           # multiple of 8 by construction
    n_tiles = pl.cdiv(rows, tile_rows)
    tiles_per_core = pl.cdiv(n_tiles, _NUM_CORE_SPLITS)

    x2 = x.reshape(rows, _LANES)
    t2 = t.reshape(rows, _LANES)

    # Static check: does the (core, tile) grid cover `rows` exactly?  If yes,
    # the in-kernel row mask is compiled out entirely.
    need_mask = (tiles_per_core * _NUM_CORE_SPLITS != n_tiles) or (
        n_tiles * tile_rows != rows)

    def in_map(c, i):
        g = c * tiles_per_core + i
        # Clamp so overhanging / duplicate tiles stay in bounds; the kernel's
        # row mask zeroes their contribution.
        return (jnp.minimum(g, n_tiles - 1), 0)

    kernel = functools.partial(
        _dice_partial_kernel, rows_valid=rows, need_mask=need_mask)

    partials = pl.pallas_call(
        kernel,
        out_shape=jax.ShapeDtypeStruct(
            (_NUM_CORE_SPLITS, 2, _SUBLANES, _LANES), jnp.float32),
        grid_spec=pltpu.PrefetchScalarGridSpec(
            num_scalar_prefetch=0,
            grid=(_NUM_CORE_SPLITS, tiles_per_core),
            in_specs=[
                pl.BlockSpec((tile_rows, _LANES), in_map),
                pl.BlockSpec((tile_rows, _LANES), in_map),
            ],
            out_specs=pl.BlockSpec(
                (1, 2, _SUBLANES, _LANES), lambda c, i: (c, 0, 0, 0)),
            scratch_shapes=[pltpu.VMEM((2, _SUBLANES, _LANES), jnp.float32)],
        ),
        compiler_params=pltpu.CompilerParams(
            dimension_semantics=("parallel", "arbitrary")),
    )(x2, t2)

    # Tiny epilogue: combine per-core (8,128) partial planes into the scalar.
    inter = jnp.sum(partials[:, 0])
    s_xt = jnp.sum(partials[:, 1])
    smooth = jnp.float32(smooth)
    return 1.0 - (2.0 * inter + smooth) / (s_xt + smooth)


def _reference(inputs, targets, smooth=1.0):
    x = jnp.reshape(inputs, (-1,)).astype(jnp.float32)
    t = jnp.reshape(targets, (-1,)).astype(jnp.float32)
    inter = jnp.sum(x * t)
    return 1.0 - (2.0 * inter + smooth) / (jnp.sum(x) + jnp.sum(t) + smooth)


if __name__ == "__main__":
    key = jax.random.PRNGKey(0)
    k1, k2 = jax.random.split(key)
    # NCHW "segmentation" shapes: inputs are probabilities, targets binary masks.
    shape = (2, 4, 16, 16)
    inputs = jax.nn.sigmoid(jax.random.normal(k1, shape, dtype=jnp.float32))
    targets = (jax.random.uniform(k2, shape) > 0.5).astype(jnp.float32)

    loss = dice_loss(inputs, targets)
    jax.block_until_ready(loss)

    ref = _reference(inputs, targets)
    np.testing.assert_allclose(np.asarray(loss), np.asarray(ref), rtol=1e-5, atol=1e-5)
    print("KERNEL_OK")
</pallas_src>

<mosaic_0001>
module attributes {stable_mosaic.version = 11 : i64} {
  func.func @_dice_partial_kernel(%arg0: i32, %arg1: i32, %arg2: memref<16x128xf32, #tpu.memory_space<vmem>>, %arg3: memref<16x128xf32, #tpu.memory_space<vmem>>, %arg4: memref<1x2x8x128xf32, #tpu.memory_space<vmem>>, %arg5: memref<2x8x128xf32, #tpu.memory_space<vmem>>) attributes {dimension_semantics = [#tpu.dimension_semantics<parallel>, #tpu.dimension_semantics<arbitrary>], iteration_bounds = array<i64: 2, 1>, scalar_prefetch = 0 : i64, scratch_operands = 1 : i64, tpu.core_type = #tpu.core_type<tc>, window_params = [{transform_indices = @transform_0, window_bounds = array<i64: 16, 128>}, {transform_indices = @transform_1, window_bounds = array<i64: 16, 128>}, {transform_indices = @transform_2, window_bounds = array<i64: 1, 2, 8, 128>}]} {
    %c0_i32 = arith.constant 0 : i32
    %0 = arith.cmpi eq, %arg1, %c0_i32 : i32
    %1 = arith.extui %0 : i1 to i32
    %c0_i32_0 = arith.constant 0 : i32
    %2 = arith.cmpi ne, %1, %c0_i32_0 : i32
    scf.if %2 {
      %cst_21 = arith.constant 0.000000e+00 : f32
      %38 = vector.broadcast %cst_21 : f32 to vector<2x8x128xf32>
      %c0_22 = arith.constant 0 : index
      %c0_23 = arith.constant 0 : index
      %c0_24 = arith.constant 0 : index
      %39 = vector.load %arg5[%c0_22, %c0_23, %c0_24] : memref<2x8x128xf32, #tpu.memory_space<vmem>>, vector<2x8x128xf32>
      tpu.vector_store %arg5[%c0_22, %c0_23, %c0_24], %38 {strides = array<i32>} : memref<2x8x128xf32, #tpu.memory_space<vmem>>, vector<2x8x128xf32>,
    } else {
    }
    %c0 = arith.constant 0 : index
    %c0_1 = arith.constant 0 : index
    %3 = vector.load %arg2[%c0, %c0_1] : memref<16x128xf32, #tpu.memory_space<vmem>>, vector<16x128xf32>
    %c0_2 = arith.constant 0 : index
    %c0_3 = arith.constant 0 : index
    %4 = vector.load %arg3[%c0_2, %c0_3] : memref<16x128xf32, #tpu.memory_space<vmem>>, vector<16x128xf32>
    %c1_i32 = arith.constant 1 : i32
    %5 = arith.muli %arg0, %c1_i32 : i32
    %6 = arith.addi %5, %arg1 : i32
    %c16_i32 = arith.constant 16 : i32
    %7 = arith.muli %6, %c16_i32 : i32
    %8 = tpu.iota {dimensions = array<i32: 0>} : vector<16x128xi32>
    %9 = vector.broadcast %7 : i32 to vector<16x128xi32>
    %10 = arith.addi %8, %9 : vector<16x128xi32>
    %c16_i32_4 = arith.constant 16 : i32
    %11 = vector.broadcast %c16_i32_4 : i32 to vector<16x128xi32>
    %12 = arith.cmpi slt, %10, %11 : vector<16x128xi32>
    %cst = arith.constant 0.000000e+00 : f32
    %13 = vector.broadcast %cst : f32 to vector<16x128xf32>
    %14 = arith.select %12, %3, %13 : vector<16x128xi1>, vector<16x128xf32>
    %cst_5 = arith.constant 0.000000e+00 : f32
    %15 = vector.broadcast %cst_5 : f32 to vector<16x128xf32>
    %16 = arith.select %12, %4, %15 : vector<16x128xi1>, vector<16x128xf32>
    %c0_6 = arith.constant 0 : index
    %c0_7 = arith.constant 0 : index
    %c0_8 = arith.constant 0 : index
    %17 = vector.load %arg5[%c0_6, %c0_7, %c0_8] : memref<2x8x128xf32, #tpu.memory_space<vmem>>, vector<1x8x128xf32>
    %18 = vector.shape_cast %17 : vector<1x8x128xf32> to vector<8x128xf32>
    %19 = arith.mulf %14, %16 : vector<16x128xf32>
    %20 = vector.shape_cast %19 : vector<16x128xf32> to vector<2x8x128xf32>
    %cst_9 = arith.constant dense<0.000000e+00> : vector<8x128xf32>
    %21 = vector.multi_reduction <add>, %20, %cst_9 [0] : vector<2x8x128xf32> to vector<8x128xf32>
    %22 = arith.addf %18, %21 : vector<8x128xf32>
    %c0_10 = arith.constant 0 : index
    %c0_11 = arith.constant 0 : index
    %c0_12 = arith.constant 0 : index
    %23 = vector.load %arg5[%c0_10, %c0_11, %c0_12] : memref<2x8x128xf32, #tpu.memory_space<vmem>>, vector<1x8x128xf32>
    %24 = vector.shape_cast %23 : vector<1x8x128xf32> to vector<8x128xf32>
    %25 = vector.shape_cast %22 : vector<8x128xf32> to vector<1x8x128xf32>
    tpu.vector_store %arg5[%c0_10, %c0_11, %c0_12], %25 {strides = array<i32>} : memref<2x8x128xf32, #tpu.memory_space<vmem>>, vector<1x8x128xf32>,
    %c1 = arith.constant 1 : index
    %c0_13 = arith.constant 0 : index
    %c0_14 = arith.constant 0 : index
    %26 = vector.load %arg5[%c1, %c0_13, %c0_14] : memref<2x8x128xf32, #tpu.memory_space<vmem>>, vector<1x8x128xf32>
    %27 = vector.shape_cast %26 : vector<1x8x128xf32> to vector<8x128xf32>
    %28 = arith.addf %14, %16 : vector<16x128xf32>
    %29 = vector.shape_cast %28 : vector<16x128xf32> to vector<2x8x128xf32>
    %cst_15 = arith.constant dense<0.000000e+00> : vector<8x128xf32>
    %30 = vector.multi_reduction <add>, %29, %cst_15 [0] : vector<2x8x128xf32> to vector<8x128xf32>
    %31 = arith.addf %27, %30 : vector<8x128xf32>
    %c1_16 = arith.constant 1 : index
    %c0_17 = arith.constant 0 : index
    %c0_18 = arith.constant 0 : index
    %32 = vector.load %arg5[%c1_16, %c0_17, %c0_18] : memref<2x8x128xf32, #tpu.memory_space<vmem>>, vector<1x8x128xf32>
    %33 = vector.shape_cast %32 : vector<1x8x128xf32> to vector<8x128xf32>
    %34 = vector.shape_cast %31 : vector<8x128xf32> to vector<1x8x128xf32>
    tpu.vector_store %arg5[%c1_16, %c0_17, %c0_18], %34 {strides = array<i32>} : memref<2x8x128xf32, #tpu.memory_space<vmem>>, vector<1x8x128xf32>,
    %c0_i32_19 = arith.constant 0 : i32
    %35 = arith.cmpi eq, %arg1, %c0_i32_19 : i32
    %36 = arith.extui %35 : i1 to i32
    %c0_i32_20 = arith.constant 0 : i32
    %37 = arith.cmpi ne, %36, %c0_i32_20 : i32
    scf.if %37 {
      %c0_21 = arith.constant 0 : index
      %c0_22 = arith.constant 0 : index
      %c0_23 = arith.constant 0 : index
      %38 = vector.load %arg5[%c0_21, %c0_22, %c0_23] : memref<2x8x128xf32, #tpu.memory_space<vmem>>, vector<2x8x128xf32>
      %c0_24 = arith.constant 0 : index
      %c0_25 = arith.constant 0 : index
      %c0_26 = arith.constant 0 : index
      %c0_27 = arith.constant 0 : index
      %39 = vector.load %arg4[%c0_24, %c0_25, %c0_26, %c0_27] : memref<1x2x8x128xf32, #tpu.memory_space<vmem>>, vector<1x2x8x128xf32>
      %40 = vector.shape_cast %39 : vector<1x2x8x128xf32> to vector<2x8x128xf32>
      %41 = vector.shape_cast %38 : vector<2x8x128xf32> to vector<1x2x8x128xf32>
      tpu.vector_store %arg4[%c0_24, %c0_25, %c0_26, %c0_27], %41 {strides = array<i32>} : memref<1x2x8x128xf32, #tpu.memory_space<vmem>>, vector<1x2x8x128xf32>,
    } else {
    }
    return
  }
  func.func @transform_0(%arg0: i32, %arg1: i32) -> (i32, i32) {
    %c1_i32 = arith.constant 1 : i32
    %0 = arith.muli %arg0, %c1_i32 : i32
    %1 = arith.addi %0, %arg1 : i32
    %c0_i32 = arith.constant 0 : i32
    %2 = arith.minsi %1, %c0_i32 : i32
    %c0_i32_0 = arith.constant 0 : i32
    %c0_i32_1 = arith.constant 0 : i32
    return %2, %c0_i32_0 : i32, i32
  }
  func.func @transform_1(%arg0: i32, %arg1: i32) -> (i32, i32) {
    %c1_i32 = arith.constant 1 : i32
    %0 = arith.muli %arg0, %c1_i32 : i32
    %1 = arith.addi %0, %arg1 : i32
    %c0_i32 = arith.constant 0 : i32
    %2 = arith.minsi %1, %c0_i32 : i32
    %c0_i32_0 = arith.constant 0 : i32
    %c0_i32_1 = arith.constant 0 : i32
    return %2, %c0_i32_0 : i32, i32
  }
  func.func @transform_2(%arg0: i32, %arg1: i32) -> (i32, i32, i32, i32) {
    %c0_i32 = arith.constant 0 : i32
    %c0_i32_0 = arith.constant 0 : i32
    %c0_i32_1 = arith.constant 0 : i32
    %c0_i32_2 = arith.constant 0 : i32
    return %arg0, %c0_i32, %c0_i32_0, %c0_i32_1 : i32, i32, i32, i32
  }
}

</mosaic_0001>

<bundles_post_ra>
// kernel: tpu_custom_call.1
= control target key start
LH: loop header
LB: loop body
LE: loop exit
PB: predicated region body
PF: predicated region fallthrough
CT: control target
= control target key end

     0   :  { %7 = vsyncpa [#allocation4], 0  ;;  %s922_s0 = inlined_call_operand.hbm [shape: f32[16,128], index: 0, kind: input, shape index: {}]   ;;  %s923_s1 = inlined_call_operand.hbm [shape: f32[16,128], index: 1, kind: input, shape index: {}]   ;;  %s924_s2 = inlined_call_operand.hbm [shape: f32[2,2,8,128], index: 2, kind: output, shape index: {}]  }
   0x1   :  { %9 = vsyncpa [#allocation4 + $0x1], 0 }
   0x2   :  { %10 = vsyncpa [#allocation7], 0 }
   0x3   :  { %12 = vsyncpa [#allocation7 + $0x1], 0 }
   0x4   :  { %13 = vsyncpa [#allocation5], 0 }
   0x5   :  { %15 = vsyncpa [#allocation5 + $0x1], 0  ;;  %s711_s9 = smov 0   ;;  %s713_s10 = smov 0  }
   0x6   :  { %s715_s11 = smov 0   ;;  %s717_s12 = smov 0  }
   0x7   :  { %s719_s13 = smov 0   ;;  %s721_s14 = smov 0  }
   0x8   :  { %s723_s15 = smov 0   ;;  %s725_s16 = smov 0  }
   0x9 LB: > { %s402_s17 = sadd.s32 4294967295, %s687_s16   ;;  %s403_s18 = sadd.s32 4294967294, %s687_s16   ;;  %s687_s16 = sphi %s725_s16, %s21_s16   ;;  %s683_s15 = sphi %s723_s15, %s943_s15   ;;  %s679_s14 = sphi %s721_s14, %s942_s14   ;;  %s675_s13 = sphi %s719_s13, %s912_s13   ;;  %s671_s12 = sphi %s717_s12, %s941_s12   ;;  %s667_s11 = sphi %s715_s11, %s940_s11   ;;  %s663_s10 = sphi %s713_s10, %s939_s10   ;;  %s659_s9 = sphi %s711_s9, %s938_s9  }
   0xa   : > { %s33_s19 = sadd.s32 1, %s683_s15  ;;  %p656_p1 = scmp.ne.s32.totalorder %s675_s13, 0 }
   0xb   : > { %p35_p0 = scmp.ge.s32.totalorder %s33_s19, 2  ;;  %p54_p2 = scmp.eq.s32.totalorder %s687_s16, 0 }
   0xc   : > { %p59_p3 = scmp.ne.s32.totalorder %s675_s13, %s671_s12  ;;  %p60_p5 = scmp.eq.s32.totalorder %s402_s17, 0 }
   0xd   : > { %s945_s19 = smov (%p35_p0, %s33_s19), 0  ;;  %p757_p4 = por %p656_p1, %p54_p2 }
   0xe   : > { %p761_p6 = por %p60_p5, %p59_p3  ;;  %s101_s22 = ssub.s32 %s683_s15, %s945_s19 }
   0xf   : > { %p102_p7 = scmp.eq.s32.totalorder %s101_s22, 0  ;;  %s104_s23 = sadd.s32 1, %s667_s11 }
  0x10   : > { %s928_s21 = scalar_select %p761_p6, 1, 0 }
  0x11   : > { %s769_s24 = scalar_select %p102_p7, %s667_s11, %s104_s23  }
  0x12   : > { %p114_p8 = scmp.ne.s32.totalorder %s667_s11, %s663_s10  ;;  %p115_p9 = scmp.eq.s32.totalorder %s402_s17, 1 }
  0x13   : > { %p120_p10 = scmp.ne.s32.totalorder %s663_s10, %s659_s9  ;;  %p121_p11 = scmp.eq.s32.totalorder %s403_s18, 1 }
  0x14   : > { %p775_p12 = por %p115_p9, %p114_p8  ;;  %p442_p1 = scmp.lt.s32.totalorder %s687_s16, 2 }
  0x15   : > { %p780_p0 = por %p121_p11, %p120_p10  ;;  %s689_s27 = smov [#allocation3]  }
  0x16   : > { %s929_s25 = scalar_select %p775_p12, 1, 0 }
  0x17   : > { %s930_s26 = scalar_select %p780_p0, 1, 0 }
  0x18   : > { %s155_s28 = sshll.u32 %s689_s27, 4  ;;  %p787_p2 = pnand %p442_p1, %p757_p4  ;;  %s156_s28 = int_to_ptr.vmem [resolvable:$true] %s155_s28 }
  0x19   : > { %s520_s4 = scalar_lea.hbm %s922_s0, 256 }
  0x1a   : > { %p521_p3 = scmp.ne.s32.totalorder %s922_s0, %s520_s4  ;;  %p522_p5 = pneg %p787_p2 }
  0x1b   : > { %p527_p8 = scmp.lt.u32.totalorder %s520_s4, %s520_s4  ;;  %p529_p9 = scmp.lt.u32.totalorder %s520_s4, %s922_s0 }
  0x1c   : > { %p523_p7 = pnand %p522_p5, %p521_p3 }
  0x1d   : > { %p530_p10 = por %p529_p9, %p527_p8 }
  0x1e   : > { %p524_p4 = pneg %p523_p7 }
  0x20   : > { %p531_p11 = pnand %p530_p10, %p524_p4 }
  0x22   : > { %534 = shalt.err (!%p531_p11)
}
  0x23   : > { %s535_s12 = scalar_lea.vmem %s156_s28, 256  ;;  %s542_s17 = scalar_lea.vmem %s156_s28, 512 }
  0x24   : > { %p536_p1 = scmp.ne.s32.totalorder %s156_s28, %s535_s12  ;;  %p543_p12 = scmp.lt.s32.totalorder %s156_s28, %s156_s28 }
  0x25   : > { %p544_p6 = scmp.lt.s32.totalorder %s542_s17, %s535_s12 }
  0x26   : > { %p538_p13 = pnand %p536_p1, %p522_p5 }
  0x27   : > { %p545_p3 = por %p544_p6, %p543_p12 }
  0x28   : > { %p539_p0 = pneg %p538_p13 }
  0x2a   : > { %p546_p7 = pnand %p545_p3, %p539_p0 }
  0x2c   : > { %549 = shalt.err (!%p546_p7)
}
  0x2d   : > { %s690_s18 = smov 128   ;;  %s691_s20 = smov 8  }
  0x2e   : > { %434 = dma.hbm_to_vmem [thread:$0]  (!%p787_p2), %s922_s0, 256, %s156_s28, [#allocation4], %s690_s18, %s690_s18, %s691_s20  }
  0x2f   : > { %p412_p13 = scmp.ge.s32.totalorder %s687_s16, 1  ;;  %p187_p4 = scmp.lt.s32.totalorder %s687_s16, 3 }
  0x30   : > { %s692_s30 = smov [#allocation6]   ;;  %s550_s6 = scalar_lea.hbm %s923_s1, 256 }
  0x31   : > { %p818_p8 = pnand %p412_p13, %p187_p4  ;;  %s179_s3 = sshll.u32 %s692_s30, 4  ;;  %s180_s3 = int_to_ptr.vmem [resolvable:$true] %s179_s3 }
  0x32   : > { %p551_p6 = scmp.ne.s32.totalorder %s923_s1, %s550_s6  ;;  %p557_p9 = scmp.lt.u32.totalorder %s550_s6, %s550_s6 }
  0x33   : > { %s932_s27 = scalar_select %p818_p8, 1, 0 }
  0x34   : > { %p553_p12 = pnand %p551_p6, %p522_p5  ;;  %p559_p10 = scmp.lt.u32.totalorder %s550_s6, %s923_s1 }
  0x36   : > { %p554_p0 = pneg %p553_p12  ;;  %p560_p11 = por %p559_p10, %p557_p9 }
  0x38   : > { %p561_p1 = pnand %p560_p11, %p554_p0 }
  0x3a   : > { %564 = shalt.err (!%p561_p1)
}
  0x3b   : > { %s565_s17 = scalar_lea.vmem %s180_s3, 256  ;;  %s572_s22 = scalar_lea.vmem %s180_s3, 512 }
  0x3c   : > { %p566_p3 = scmp.ne.s32.totalorder %s180_s3, %s565_s17  ;;  %p573_p4 = scmp.lt.s32.totalorder %s180_s3, %s180_s3 }
  0x3d   : > { %p574_p8 = scmp.lt.s32.totalorder %s572_s22, %s565_s17 }
  0x3e   : > { %p568_p7 = pnand %p566_p3, %p522_p5 }
  0x3f   : > { %p575_p6 = por %p574_p8, %p573_p4 }
  0x40   : > { %p569_p13 = pneg %p568_p7 }
  0x42   : > { %p576_p12 = pnand %p575_p6, %p569_p13 }
  0x44   : > { %579 = shalt.err (!%p576_p12)
}
  0x45   : > { %437 = dma.hbm_to_vmem [thread:$0]  (!%p787_p2), %s923_s1, 256, %s180_s3, [#allocation7], %s690_s18, %s690_s18, %s691_s20  }
  0x46   : > { %p933_p0 = scmp.ne.s32.totalorder %s932_s27, 0 }
  0x47   : > { %s193_s4 = sand.u32 (!%p933_p0), 1, %s675_s13   ;;  %p934_p5 = scmp.ne.s32.totalorder (!%p933_p0), %s928_s21, 0 }
  0x48   : > { %191 = sbr.rel (%p933_p0) target bundleno = 111 (0x6f), region = 28  ;;  %s413_s5 = sshll.u32 (!%p933_p0), %s193_s4, 4 }
  0x49   : > { %s194_s6 = scalar_lea.sflag (!%p933_p0), [#allocation4], %s193_s4  ;;  %s197_s7 = scalar_lea.vmem (!%p933_p0), [#allocation3], %s413_s5 }
  0x4f   : > { %645 = dma.done.wait (%p934_p5), %s194_s6, 256  }
  0x50   : > { %647 = vsyncadd (%p934_p5), %s194_s6, 4294967040  ;;  %s203_s29 = scalar_lea.sflag [#allocation7], %s193_s4  ;;  %s206_s8 = scalar_lea.vmem [#allocation6], %s413_s5 }
  0x51   : > { %649 = dma.done.wait (%p934_p5), %s203_s29, 256  }
  0x52   : > { %651 = vsyncadd (%p934_p5), %s203_s29, 4294967040  ;;  %s229_s18 = sand.u32 1, %s663_s10   ;;  %s416_s20 = sshll.u32 %s679_s14, 4  ;;  %v252_v0 = vlaneseq  ;;  %v246_v6 = vld [vmem:[%s197_s7] sm:$0xff]  ;;  %v247_v7 = vld [vmem:[%s197_s7 + $0x8] sm:$0xff] }
  0x53   : > { %v255_v1 = vstv %s416_s20  ;;  %s415_s27 = sshll.u32 %s229_s18, 4  ;;  %v248_v8 = vld [vmem:[%s206_s8] sm:$0xff]  ;;  %v249_v9 = vld [vmem:[%s206_s8 + $0x8] sm:$0xff]  ;;  %s424_s28 = sshll.u32 %s679_s14, 8 }
  0x54   : > { %v253_v2 = vshrl.u32 %v252_v0, 7  ;;  %s231_s21 = scalar_lea.vmem [#allocation8], %s415_s27  ;;  %s866_s22 = scalar_lea.hbm %s924_s2, %s424_s28 }
  0x55   : > { %s298_s3 = sshll.u32 %s231_s21, 4  ;;  %s870_s14 = scalar_lea.sflag [#allocation5], %s229_s18  ;;  %s861_s3 = int_to_ptr.vmem [resolvable:$true] %s298_s3 }
  0x56   : > { %v254_v3 = vadd.s32 8, %v253_v2  ;;  %v256_v4 = vadd.s32 %v255_v1, %v253_v2  ;;  %s580_s23 = scalar_lea.vmem %s861_s3, 256  ;;  %p935_p8 = scmp.ne.s32.totalorder %s929_s25, 0 }
  0x57   : > { %p581_p2 = scmp.ne.s32.totalorder %s861_s3, %s580_s23  ;;  %s693_s30 = smov [#allocation8]  }
  0x58   : > { %v257_v5 = vadd.s32 %v255_v1, %v254_v3  ;;  %vm258_vm0 = vcmp.lt.s32.totalorder %v256_v4, 16  ;;  %s584_s4 = sshll.u32 %s693_s30, 4  ;;  %s585_s4 = int_to_ptr.vmem [resolvable:$false] %s584_s4 }
  0x59   : > { %v260_v10 = vsel %vm258_vm0, %v246_v6, 0.0  ;;  %v262_v11 = vsel %vm258_vm0, %v248_v8, 0.0  ;;  %p582_p9 = pnand %p581_p2, %p935_p8  ;;  %s586_s5 = scalar_lea.vmem %s585_s4, 512 }
  0x5a   : > { %vm259_vm1 = vcmp.lt.s32.totalorder %v257_v5, 16  ;;  %v265_v14 = vmul.f32 %v262_v11, %v260_v10  ;;  %v272_v15 = vadd.f32 %v262_v11, %v260_v10  ;;  %p587_p11 = scmp.lt.s32.totalorder %s861_s3, %s585_s4  ;;  %p588_p1 = scmp.lt.s32.totalorder %s586_s5, %s580_s23 }
  0x5b   : > { %v261_v12 = vsel %vm259_vm1, %v247_v7, 0.0  ;;  %v263_v13 = vsel %vm259_vm1, %v249_v9, 0.0  ;;  %p583_p10 = pneg %p582_p9 }
  0x5c   : > { %v266_v16 = vmul.f32 %v263_v13, %v261_v12  ;;  %v273_v17 = vadd.f32 %v263_v13, %v261_v12  ;;  %p589_p3 = por %p588_p1, %p587_p11 }
  0x5e   : > { %v267_v18 = vadd.f32 %v266_v16, %v265_v14  ;;  %v274_v19 = vadd.f32 %v273_v17, %v272_v15  ;;  %p590_p7 = pnand %p589_p3, %p583_p10 }
  0x60   : > { %282 = vst [vmem:[%s231_s21] sm:$0xff] %v267_v18  ;;  %283 = vst [vmem:[%s231_s21 + $0x8] sm:$0xff] %v274_v19 }
  0x61   : > { %593 = shalt.err (!%p590_p7)
}
  0x62   : > { %s594_s6 = scalar_lea.hbm %s866_s22, 256  ;;  %s598_s8 = scalar_lea.hbm %s924_s2, 512 }
  0x63   : > { %p595_p13 = scmp.ne.s32.totalorder %s866_s22, %s594_s6  ;;  %p599_p12 = scmp.lt.u32.totalorder %s866_s22, %s924_s2 }
  0x64   : > { %p600_p0 = scmp.lt.u32.totalorder %s598_s8, %s594_s6  ;;  %p602_p2 = scmp.lt.u32.totalorder %s594_s6, %s866_s22 }
  0x65   : > { %p596_p4 = pnand %p595_p13, %p935_p8 }
  0x66   : > { %p601_p5 = por %p600_p0, %p599_p12 }
  0x67   : > { %p597_p6 = pneg %p596_p4 }
  0x68   : > { %p603_p9 = por %p602_p2, %p601_p5 }
  0x6a   : > { %p604_p10 = pnand %p603_p9, %p597_p6 }
  0x6c   : > { %607 = shalt.err (!%p604_p10)
}
  0x6d   : > { %s694_s27 = smov 128   ;;  %s695_s21 = smov 8  }
  0x6e   : > { %429 = dma.vmem_to_hbm [thread:$0]  (%p935_p8), %s861_s3, 256, %s866_s22, %s870_s14, %s694_s27, %s694_s27, %s695_s21  }
  0x6f PF: > { %s313_s28 = sand.u32 1, %s659_s9   ;;  %p936_p11 = scmp.ne.s32.totalorder %s930_s26, 0 }
  0x70   : > { %p937_p1 = scmp.ge.s32.totalorder %s687_s16, 2  ;;  %s314_s12 = scalar_lea.sflag [#allocation5], %s313_s28 }
  0x72   : > { %p439_p3 = pnand %p937_p1, %p936_p11 }
  0x74   : > { %653 = dma.done.wait (!%p439_p3), %s314_s12, 256  }
  0x75   : > { %655 = vsyncadd (!%p439_p3), %s314_s12, 4294967040  ;;  %s21_s16 = sadd.s32 1, %s687_s16   ;;  %s938_s9 = smov %s663_s10 }
  0x76   : > { %p18_p7 = scmp.ge.s32.totalorder %s21_s16, 4   ;;  %s939_s10 = smov %s667_s11 }
  0x77   : > { %s940_s11 = smov %s769_s24  ;;  %s941_s12 = smov %s675_s13 }
  0x78   : > { %s912_s13 = smov 0   ;;  %s942_s14 = smov %s683_s15 }
  0x79   : > { %s943_s15 = smov %s945_s19  ;;  %20 = sbr.rel (!%p18_p7) target bundleno = 9 (0x9), region = 95 }
  0x80   :  { %319 = vsyncpa [#allocation4], 1 }
  0x81   :  { %321 = vsyncpa [#allocation4 + $0x1], 1 }
  0x82   :  { %322 = vsyncpa [#allocation7], 1 }
  0x83   :  { %324 = vsyncpa [#allocation7 + $0x1], 1 }
  0x84   :  { %325 = vsyncpa [#allocation5], 1 }
  0x85   :  { %327 = vsyncpa [#allocation5 + $0x1], 1 }

</bundles_post_ra>
